<compile_context>
chip_gen: v5e
topology: v5e:2x2
jax: 0.10.0
libtpu: 0.0.40
codegen_flags: <defaults>
</compile_context>

<pallas_src>
import functools

import jax
import jax.numpy as jnp
from jax.experimental import pallas as pl
from jax.experimental.pallas import tpu as pltpu


def _shifting_kernel(x_ref, s1_ref, s2_ref, w_ref, o_ref):
    # x_ref: [tb, nb, P, C] (natural block order; flip is folded into w_ref)
    # s1_ref/s2_ref: [tb, 1, C]
    # w_ref: [(2 + 2*nb)*C, O]  -- W1 @ W2, row-blocks pre-permuted for the flip
    # o_ref: [tb, O]
    tb, nb, P, C = x_ref.shape

    x = x_ref[...]
    xf = x if x.dtype == jnp.float32 else x.astype(jnp.float32)

    # Per-block statistics, vectorized over all nb blocks at once.
    m = jnp.mean(xf, axis=2)                          # [tb, nb, C]
    d = xf - m[:, :, None, :]
    var = jnp.mean(d * d, axis=2)                     # biased (unbiased=False)
    std = jnp.sqrt(var + 1e-5)                        # [tb, nb, C]

    s1 = s1_ref[...].astype(jnp.float32)[:, 0, :]     # [tb, C]
    s2 = s2_ref[...].astype(jnp.float32)[:, 0, :]     # [tb, C]

    # feat @ W_eff, decomposed as a sum of per-piece partial products against
    # statically-sliced row groups of W_eff. Feature (row-group) order:
    #   [mean_0 .. mean_{nb-1}, std_0 .. std_{nb-1}, stats1, stats2], each C wide
    # (in natural block order; the flip permutation already lives in w_ref).
    acc = jnp.dot(s1, w_ref[2 * nb * C:(2 * nb + 1) * C, :],
                  preferred_element_type=jnp.float32)
    acc = acc + jnp.dot(s2, w_ref[(2 * nb + 1) * C:(2 * nb + 2) * C, :],
                        preferred_element_type=jnp.float32)
    for j in range(nb):
        acc = acc + jnp.dot(m[:, j, :], w_ref[j * C:(j + 1) * C, :],
                            preferred_element_type=jnp.float32)
        acc = acc + jnp.dot(std[:, j, :],
                            w_ref[(nb + j) * C:(nb + j + 1) * C, :],
                            preferred_element_type=jnp.float32)

    o_ref[...] = acc.astype(o_ref.dtype)


def shifting_module_forward(x, stats1, stats2, w1_t, w2_t, *, pred_len,
                            vmem_budget_bytes=4 * 1024 * 1024):
    """x: [B, S, C]; stats1/stats2: [B, 1, C]; w1_t: [F, H]; w2_t: [H, O] -> [B, O]."""
    B, S, C = x.shape
    assert S % pred_len == 0, "seq_len must be divisible by pred_len (as in PyTorch)"
    nb = S // pred_len
    F = (2 + 2 * nb) * C
    assert w1_t.shape[0] == F
    O = w2_t.shape[1]

    # Fold the two bias-free Linears:  feat @ W1 @ W2  ==  feat @ (W1 @ W2).
    w_eff = jnp.dot(w1_t, w2_t)                                     # [F, O]

    # Absorb the time flip: per-block mean/std are invariant to the within-block
    # flip, so flipping only reverses the block order.  Reverse the mean-block
    # and std-block row groups of W_eff so the kernel uses natural block order.
    wm = jnp.flip(w_eff[:nb * C].reshape(nb, C, O), axis=0).reshape(nb * C, O)
    ws = jnp.flip(w_eff[nb * C:2 * nb * C].reshape(nb, C, O), axis=0).reshape(nb * C, O)
    w_eff = jnp.concatenate([wm, ws, w_eff[2 * nb * C:]], axis=0)   # [F, O]

    # Free (row-major bitcast) reshape so the kernel sees per-block structure.
    x4 = x.reshape(B, nb, pred_len, C)

    # Batch tile sized for double-buffered VMEM (per-buffer budget).
    bytes_per_row = S * C * x.dtype.itemsize
    tb = max(1, vmem_budget_bytes // bytes_per_row)
    tb = min(tb, B)
    if tb < B:
        # Partial batch tiles: keep the sublane tiling constraint happy.
        tb = max(8, (tb // 8) * 8) if B >= 8 else B
    n_tiles = pl.cdiv(B, tb)
    Bp = n_tiles * tb
    if Bp != B:
        pad = Bp - B
        x4 = jnp.pad(x4, ((0, pad), (0, 0), (0, 0), (0, 0)))
        stats1 = jnp.pad(stats1, ((0, pad), (0, 0), (0, 0)))
        stats2 = jnp.pad(stats2, ((0, pad), (0, 0), (0, 0)))

    out = pl.pallas_call(
        _shifting_kernel,
        out_shape=jax.ShapeDtypeStruct((Bp, O), jnp.float32),
        grid_spec=pltpu.PrefetchScalarGridSpec(
            num_scalar_prefetch=0,
            grid=(n_tiles,),
            in_specs=[
                pl.BlockSpec((tb, nb, pred_len, C), lambda b: (b, 0, 0, 0)),
                pl.BlockSpec((tb, 1, C), lambda b: (b, 0, 0)),
                pl.BlockSpec((tb, 1, C), lambda b: (b, 0, 0)),
                pl.BlockSpec((F, O), lambda b: (0, 0)),
            ],
            out_specs=pl.BlockSpec((tb, O), lambda b: (b, 0)),
        ),
        compiler_params=pltpu.CompilerParams(
            dimension_semantics=("parallel",)),
    )(x4, stats1, stats2, w_eff)
    return out[:B]


def _reference_forward(x, stats1, stats2, w1_t, w2_t, pred_len):
    """Pure-JAX mirror of the PyTorch forward (for correctness checking)."""
    B, S, C = x.shape
    nb = S // pred_len
    xf = jnp.flip(x, axis=1)
    blocks = xf.reshape(B, nb, pred_len, C)
    hist_mean = blocks.mean(axis=2)
    hist_std = jnp.sqrt(blocks.var(axis=2) + 1e-5)
    hist_stat = jnp.concatenate([hist_mean, hist_std], axis=1)
    feat = jnp.concatenate([hist_stat, stats1, stats2], axis=1).reshape(B, -1)
    return (feat @ w1_t) @ w2_t


def _make_case(key, batch, seq_len, enc_in, pred_len, hidden, output_dim):
    nb = seq_len // pred_len
    in_features = (2 + nb * 2) * enc_in
    kx, k1, k2, kw1, kw2 = jax.random.split(key, 5)
    x = jax.random.normal(kx, (batch, seq_len, enc_in), dtype=jnp.float32)
    s1 = jax.random.normal(k1, (batch, 1, enc_in), dtype=jnp.float32)
    s2 = jax.random.normal(k2, (batch, 1, enc_in), dtype=jnp.float32)
    w1_t = (jax.random.normal(kw1, (in_features, hidden), dtype=jnp.float32)
            * (1.0 / jnp.sqrt(in_features)))
    w2_t = (jax.random.normal(kw2, (hidden, output_dim), dtype=jnp.float32)
            * (1.0 / jnp.sqrt(hidden)))
    return x, s1, s2, w1_t, w2_t


if __name__ == "__main__":
    # enc_in is effectively hard-coded to 24 in the PyTorch forward
    # (hist_mean/hist_std last dim = 24).
    enc_in = 24
    seq_len = 8
    pred_len = 4
    hidden = 32
    output_dim = 2

    key = jax.random.PRNGKey(0)
    k_a, k_b = jax.random.split(key)

    # Case 1: small single-tile case (batch=2).
    x, s1, s2, w1_t, w2_t = _make_case(k_a, 2, seq_len, enc_in, pred_len,
                                       hidden, output_dim)
    y = shifting_module_forward(x, s1, s2, w1_t, w2_t, pred_len=pred_len)
    y = jax.block_until_ready(y)
    y_ref = _reference_forward(x, s1, s2, w1_t, w2_t, pred_len)
    assert y.shape == (2, output_dim)
    assert jnp.allclose(y, y_ref, atol=1e-4, rtol=1e-4), (y, y_ref)

    # Case 2: exercise the pipelined batch grid + padding path
    # (batch=10, tiny VMEM budget -> tile of 8, 2 grid steps, padded to 16).
    x, s1, s2, w1_t, w2_t = _make_case(k_b, 10, seq_len, enc_in, pred_len,
                                       hidden, output_dim)
    y = shifting_module_forward(x, s1, s2, w1_t, w2_t, pred_len=pred_len,
                                vmem_budget_bytes=seq_len * enc_in * 4 * 8)
    y = jax.block_until_ready(y)
    y_ref = _reference_forward(x, s1, s2, w1_t, w2_t, pred_len)
    assert y.shape == (10, output_dim)
    assert jnp.allclose(y, y_ref, atol=1e-4, rtol=1e-4), (y, y_ref)

    print("KERNEL_OK")
</pallas_src>

<mosaic_0001>
module attributes {stable_mosaic.version = 11 : i64} {
  func.func @_shifting_kernel(%arg0: i32, %arg1: memref<2x2x4x24xf32, #tpu.memory_space<vmem>>, %arg2: memref<2x1x24xf32, #tpu.memory_space<vmem>>, %arg3: memref<2x1x24xf32, #tpu.memory_space<vmem>>, %arg4: memref<144x2xf32, #tpu.memory_space<vmem>>, %arg5: memref<2x2xf32, #tpu.memory_space<vmem>>) attributes {dimension_semantics = [#tpu.dimension_semantics<parallel>], iteration_bounds = array<i64: 1>, scalar_prefetch = 0 : i64, scratch_operands = 0 : i64, tpu.core_type = #tpu.core_type<tc>, window_params = [{transform_indices = @transform_0, window_bounds = array<i64: 2, 2, 4, 24>}, {transform_indices = @transform_1, window_bounds = array<i64: 2, 1, 24>}, {transform_indices = @transform_2, window_bounds = array<i64: 2, 1, 24>}, {pipeline_mode = #tpu.pipeline_mode<synchronous>, transform_indices = @transform_3, window_bounds = array<i64: 144, 2>}, {transform_indices = @transform_4, window_bounds = array<i64: 2, 2>}]} {
    %c0 = arith.constant 0 : index
    %c0_0 = arith.constant 0 : index
    %c0_1 = arith.constant 0 : index
    %c0_2 = arith.constant 0 : index
    %0 = vector.load %arg1[%c0, %c0_0, %c0_1, %c0_2] : memref<2x2x4x24xf32, #tpu.memory_space<vmem>>, vector<2x2x4x24xf32>
    %cst = arith.constant dense<0.000000e+00> : vector<2x2x24xf32>
    %1 = vector.multi_reduction <add>, %0, %cst [2] : vector<2x2x4x24xf32> to vector<2x2x24xf32>
    %cst_3 = arith.constant 4.000000e+00 : f32
    %2 = vector.broadcast %cst_3 : f32 to vector<2x2x24xf32>
    %3 = arith.divf %1, %2 : vector<2x2x24xf32>
    %4 = vector.shape_cast %3 : vector<2x2x24xf32> to vector<2x2x1x24xf32>
    %5 = vector.broadcast %4 : vector<2x2x1x24xf32> to vector<2x2x4x24xf32>
    %6 = arith.subf %0, %5 : vector<2x2x4x24xf32>
    %7 = arith.mulf %6, %6 : vector<2x2x4x24xf32>
    %cst_4 = arith.constant dense<0.000000e+00> : vector<2x2x24xf32>
    %8 = vector.multi_reduction <add>, %7, %cst_4 [2] : vector<2x2x4x24xf32> to vector<2x2x24xf32>
    %cst_5 = arith.constant 4.000000e+00 : f32
    %9 = vector.broadcast %cst_5 : f32 to vector<2x2x24xf32>
    %10 = arith.divf %8, %9 : vector<2x2x24xf32>
    %cst_6 = arith.constant 9.99999974E-6 : f32
    %11 = vector.broadcast %cst_6 : f32 to vector<2x2x24xf32>
    %12 = arith.addf %10, %11 : vector<2x2x24xf32>
    %13 = math.sqrt %12 : vector<2x2x24xf32>
    %c0_7 = arith.constant 0 : index
    %c0_8 = arith.constant 0 : index
    %c0_9 = arith.constant 0 : index
    %14 = vector.load %arg2[%c0_7, %c0_8, %c0_9] : memref<2x1x24xf32, #tpu.memory_space<vmem>>, vector<2x1x24xf32>
    %15 = vector.shape_cast %14 : vector<2x1x24xf32> to vector<2x24xf32>
    %c0_10 = arith.constant 0 : index
    %c0_11 = arith.constant 0 : index
    %c0_12 = arith.constant 0 : index
    %16 = vector.load %arg3[%c0_10, %c0_11, %c0_12] : memref<2x1x24xf32, #tpu.memory_space<vmem>>, vector<2x1x24xf32>
    %17 = vector.shape_cast %16 : vector<2x1x24xf32> to vector<2x24xf32>
    %c96 = arith.constant 96 : index
    %c0_13 = arith.constant 0 : index
    %18 = vector.load %arg4[%c96, %c0_13] : memref<144x2xf32, #tpu.memory_space<vmem>>, vector<24x2xf32>
    %cst_14 = arith.constant dense<0.000000e+00> : vector<2x2xf32>
    %19 = tpu.matmul %15, %18, %cst_14 {dimension_numbers = #tpu.dot_dimension_numbers<[1], [0], [0], [1], [0, 0, 1, 1], [], []>} : vector<2x24xf32>, vector<24x2xf32>, vector<2x2xf32> -> vector<2x2xf32>
    %c120 = arith.constant 120 : index
    %c0_15 = arith.constant 0 : index
    %20 = vector.load %arg4[%c120, %c0_15] : memref<144x2xf32, #tpu.memory_space<vmem>>, vector<24x2xf32>
    %cst_16 = arith.constant dense<0.000000e+00> : vector<2x2xf32>
    %21 = tpu.matmul %17, %20, %cst_16 {dimension_numbers = #tpu.dot_dimension_numbers<[1], [0], [0], [1], [0, 0, 1, 1], [], []>} : vector<2x24xf32>, vector<24x2xf32>, vector<2x2xf32> -> vector<2x2xf32>
    %22 = arith.addf %19, %21 : vector<2x2xf32>
    %23 = vector.extract_strided_slice %3 {offsets = [0, 0, 0], sizes = [2, 1, 24], strides = [1, 1, 1]} : vector<2x2x24xf32> to vector<2x1x24xf32>
    %24 = vector.shape_cast %23 : vector<2x1x24xf32> to vector<2x24xf32>
    %c0_17 = arith.constant 0 : index
    %c0_18 = arith.constant 0 : index
    %25 = vector.load %arg4[%c0_17, %c0_18] : memref<144x2xf32, #tpu.memory_space<vmem>>, vector<24x2xf32>
    %cst_19 = arith.constant dense<0.000000e+00> : vector<2x2xf32>
    %26 = tpu.matmul %24, %25, %cst_19 {dimension_numbers = #tpu.dot_dimension_numbers<[1], [0], [0], [1], [0, 0, 1, 1], [], []>} : vector<2x24xf32>, vector<24x2xf32>, vector<2x2xf32> -> vector<2x2xf32>
    %27 = arith.addf %22, %26 : vector<2x2xf32>
    %28 = vector.extract_strided_slice %13 {offsets = [0, 0, 0], sizes = [2, 1, 24], strides = [1, 1, 1]} : vector<2x2x24xf32> to vector<2x1x24xf32>
    %29 = vector.shape_cast %28 : vector<2x1x24xf32> to vector<2x24xf32>
    %c48 = arith.constant 48 : index
    %c0_20 = arith.constant 0 : index
    %30 = vector.load %arg4[%c48, %c0_20] : memref<144x2xf32, #tpu.memory_space<vmem>>, vector<24x2xf32>
    %cst_21 = arith.constant dense<0.000000e+00> : vector<2x2xf32>
    %31 = tpu.matmul %29, %30, %cst_21 {dimension_numbers = #tpu.dot_dimension_numbers<[1], [0], [0], [1], [0, 0, 1, 1], [], []>} : vector<2x24xf32>, vector<24x2xf32>, vector<2x2xf32> -> vector<2x2xf32>
    %32 = arith.addf %27, %31 : vector<2x2xf32>
    %33 = vector.extract_strided_slice %3 {offsets = [0, 1, 0], sizes = [2, 1, 24], strides = [1, 1, 1]} : vector<2x2x24xf32> to vector<2x1x24xf32>
    %34 = vector.shape_cast %33 : vector<2x1x24xf32> to vector<2x24xf32>
    %c24 = arith.constant 24 : index
    %c0_22 = arith.constant 0 : index
    %35 = vector.load %arg4[%c24, %c0_22] : memref<144x2xf32, #tpu.memory_space<vmem>>, vector<24x2xf32>
    %cst_23 = arith.constant dense<0.000000e+00> : vector<2x2xf32>
    %36 = tpu.matmul %34, %35, %cst_23 {dimension_numbers = #tpu.dot_dimension_numbers<[1], [0], [0], [1], [0, 0, 1, 1], [], []>} : vector<2x24xf32>, vector<24x2xf32>, vector<2x2xf32> -> vector<2x2xf32>
    %37 = arith.addf %32, %36 : vector<2x2xf32>
    %38 = vector.extract_strided_slice %13 {offsets = [0, 1, 0], sizes = [2, 1, 24], strides = [1, 1, 1]} : vector<2x2x24xf32> to vector<2x1x24xf32>
    %39 = vector.shape_cast %38 : vector<2x1x24xf32> to vector<2x24xf32>
    %c72 = arith.constant 72 : index
    %c0_24 = arith.constant 0 : index
    %40 = vector.load %arg4[%c72, %c0_24] : memref<144x2xf32, #tpu.memory_space<vmem>>, vector<24x2xf32>
    %cst_25 = arith.constant dense<0.000000e+00> : vector<2x2xf32>
    %41 = tpu.matmul %39, %40, %cst_25 {dimension_numbers = #tpu.dot_dimension_numbers<[1], [0], [0], [1], [0, 0, 1, 1], [], []>} : vector<2x24xf32>, vector<24x2xf32>, vector<2x2xf32> -> vector<2x2xf32>
    %42 = arith.addf %37, %41 : vector<2x2xf32>
    %c0_26 = arith.constant 0 : index
    %c0_27 = arith.constant 0 : index
    %43 = vector.load %arg5[%c0_26, %c0_27] : memref<2x2xf32, #tpu.memory_space<vmem>>, vector<2x2xf32>
    tpu.vector_store %arg5[%c0_26, %c0_27], %42 {strides = array<i32>} : memref<2x2xf32, #tpu.memory_space<vmem>>, vector<2x2xf32>,
    return
  }
  func.func @transform_0(%arg0: i32) -> (i32, i32, i32, i32) {
    %c0_i32 = arith.constant 0 : i32
    %c0_i32_0 = arith.constant 0 : i32
    %c0_i32_1 = arith.constant 0 : i32
    %c0_i32_2 = arith.constant 0 : i32
    return %arg0, %c0_i32, %c0_i32_0, %c0_i32_1 : i32, i32, i32, i32
  }
  func.func @transform_1(%arg0: i32) -> (i32, i32, i32) {
    %c0_i32 = arith.constant 0 : i32
    %c0_i32_0 = arith.constant 0 : i32
    %c0_i32_1 = arith.constant 0 : i32
    return %arg0, %c0_i32, %c0_i32_0 : i32, i32, i32
  }
  func.func @transform_2(%arg0: i32) -> (i32, i32, i32) {
    %c0_i32 = arith.constant 0 : i32
    %c0_i32_0 = arith.constant 0 : i32
    %c0_i32_1 = arith.constant 0 : i32
    return %arg0, %c0_i32, %c0_i32_0 : i32, i32, i32
  }
  func.func @transform_3(%arg0: i32) -> (i32, i32) {
    %c0_i32 = arith.constant 0 : i32
    %c0_i32_0 = arith.constant 0 : i32
    %c0_i32_1 = arith.constant 0 : i32
    return %c0_i32, %c0_i32_0 : i32, i32
  }
  func.func @transform_4(%arg0: i32) -> (i32, i32) {
    %c0_i32 = arith.constant 0 : i32
    %c0_i32_0 = arith.constant 0 : i32
    return %arg0, %c0_i32 : i32, i32
  }
}

</mosaic_0001>

<bundles_post_ra>
// kernel: tpu_custom_call.1
= control target key start
LH: loop header
LB: loop body
LE: loop exit
PB: predicated region body
PF: predicated region fallthrough
CT: control target
= control target key end

     0   :  { %vm22_vm0 = vcmask 191488   ;;  %v400_v6 = vmov 4.0   ;;  %s553_s0 = inlined_call_operand.vmem [shape: f32[2,2,4,24], index: 0, kind: input, shape index: {}]   ;;  %s554_s1 = inlined_call_operand.vmem [shape: f32[2,1,24], index: 1, kind: input, shape index: {}]   ;;  %s555_s2 = inlined_call_operand.vmem [shape: f32[2,1,24], index: 2, kind: input, shape index: {}]   ;;  %s556_s3 = inlined_call_operand.vmem [shape: f32[144,2], index: 3, kind: input, shape index: {}]   ;;  %s557_s4 = inlined_call_operand.hbm [shape: f32[2,2], index: 4, kind: output, shape index: {}]  }
   0x1   :  { %v223_v0 = vld [vmem:[%s556_s3 + $0x10] sm:$0xff]  ;;  %v222_v1 = vld [vmem:[%s556_s3 + $0x8] sm:$0xff]  ;;  %v221_v4 = vld [vmem:[%s556_s3] sm:$0xff]  ;;  %364 = vrcp.f32 %v400_v6 }
   0x2   :  { %v163_v2 = vld [vmem:[%s556_s3 + $0x88] sm:$0xff]  ;;  %243 = vmatpush.msra.mxu2 %v223_v0  ;;  %v160_v3 = vld [vmem:[%s556_s3 + $0x70] sm:$0xff]  ;;  %v253_v5 = vld [vmem:[%s556_s3 + $0x40] sm:$0xff] }
   0x3   :  { %186 = vmatpush.msra.mxu0 %v163_v2  ;;  %214 = vmatpush.msra.mxu1 %v160_v3  ;;  %v448_v7 = vld [vmem:[%s553_s0] sm:$0xf]  ;;  %v453_v8 = vld [vmem:[%s553_s0 + $0x8] sm:$0xf]  ;;  %v458_v9 = vld [vmem:[%s553_s0 + $0x4] sm:$0xf] }
   0x4   :  { %272 = vmatpush.msra.mxu3 %v253_v5  ;;  %244 = vmatpush.msra.mxu2 %v222_v1  ;;  %v23_v10 = vsel %vm22_vm0, %v448_v7, 0.0  ;;  %v37_v11 = vsel %vm22_vm0, %v453_v8, 0.0  ;;  %v467_v12 = vld [vmem:[%s553_s0 + $0xc] sm:$0xf]  ;;  %v30_v13 = vsel %vm22_vm0, %v458_v9, 0.0 }
   0x5   :  { %v24_v14 = vrot.slane %v23_v10, 4  ;;  %v38_v15 = vrot.slane %v37_v11, 4  ;;  %v31_v16 = vrot.slane %v30_v13, 4  ;;  %v44_v17 = vsel %vm22_vm0, %v467_v12, 0.0 }
   0x6   :  { %9 = vsyncpa [#allocation3], 0  ;;  %245 = vmatpush.msra.mxu2 %v221_v4  ;;  %v45_v18 = vrot.slane %v44_v17, 4  ;;  %v162_v21 = vld [vmem:[%s556_s3 + $0x80] sm:$0xff]  ;;  %v159_v22 = vld [vmem:[%s556_s3 + $0x68] sm:$0xff]  ;;  %vm226_vm2 = vcmask 1041409  }
   0x7   :  { %v25_v19 = vadd.f32 %v24_v14, %v23_v10  ;;  %v39_v20 = vadd.f32 %v38_v15, %v37_v11  ;;  %v252_v23 = vld [vmem:[%s556_s3 + $0x38] sm:$0xff]  ;;  %v365_v24 = vpop.eup %364  ;;  %187 = vmatpush.msra.mxu0 %v162_v21  ;;  %215 = vmatpush.msra.mxu1 %v159_v22  ;;  %v158_v26 = vld [vmem:[%s556_s3 + $0x60] sm:$0xff]  ;;  %v251_v27 = vld [vmem:[%s556_s3 + $0x30] sm:$0xff]  ;;  %v32_v28 = vadd.f32 %v31_v16, %v30_v13  ;;  %vm170_vm3 = vcmask 195584   ;;  %s347_s14 = sshll.u32 %s557_s4, 4  ;;  %s348_s14 = int_to_ptr.hbm [resolvable:$true] %s347_s14 }
   0x8   :  { %v161_v25 = vld [vmem:[%s556_s3 + $0x78] sm:$0xff]  ;;  %v46_v29 = vadd.f32 %v45_v18, %v44_v17  ;;  %v52_v32 = vmul.f32 4.0, %v365_v24  ;;  %273 = vmatpush.msra.mxu3 %v252_v23  ;;  %v156_v33 = vld [vmem:[%s555_s2] sm:$0x1]  ;;  %v157_v34 = vld [vmem:[%s555_s2 + $0x1] sm:$0x1]  ;;  %vm56_vm1 = vweird.f32 %v365_v24 }
   0x9   :  { %v26_v30 = vrot.slane %v25_v19, 2  ;;  %v40_v31 = vrot.slane %v39_v20, 2  ;;  %188 = vmatpush.msra.mxu0 %v161_v25  ;;  %216 = vmatpush.msra.mxu1 %v158_v26  ;;  %166 = vst [vmem:[#allocation1] ss:$9 sm:$0xff] %v156_v33  ;;  %v33_v38 = vrot.slane %v32_v28, 2  ;;  %v282_v23 = vld [vmem:[%s556_s3 + $0x28] sm:$0xff] }
   0xa   :  { %v53_v37 = vsub.f32 1.0, %v52_v32  ;;  %274 = vmatpush.msra.mxu3 %v251_v27  ;;  %168 = vst [vmem:[#allocation1 + $0x1] ss:$9 sm:$0xff] %v157_v34  ;;  %v47_v39 = vrot.slane %v46_v29, 2  ;;  %v154_v51 = vld [vmem:[%s554_s1] sm:$0x1] }
   0xb   :  { %v27_v35 = vadd.f32 %v26_v30, %v25_v19  ;;  %v41_v36 = vadd.f32 %v40_v31, %v39_v20  ;;  %v34_v43 = vadd.f32 %v33_v38, %v32_v28  ;;  %v155_v55 = vld [vmem:[%s554_s1 + $0x1] sm:$0x1]  ;;  %301 = vmatpush.msrb.mxu0 %v282_v23  ;;  %v310_v30 = vld [vmem:[%s556_s3 + $0x50] sm:$0xff]  ;;  %v280_v31 = vld [vmem:[%s556_s3 + $0x18] sm:$0xff]  ;;  %vm338_vm12 = vcmask 9216  }
   0xc   :  { %v54_v42 = vmul.f32 %v365_v24, %v53_v37  ;;  %v48_v44 = vadd.f32 %v47_v39, %v46_v29  ;;  %v281_v25 = vld [vmem:[%s556_s3 + $0x20] sm:$0xff]  ;;  %v309_v34 = vld [vmem:[%s556_s3 + $0x48] sm:$0xff] }
   0xd   :  { %v28_v40 = vrot.slane %v27_v35, 1  ;;  %v42_v41 = vrot.slane %v41_v36, 1  ;;  %v35_v48 = vrot.slane %v34_v43, 1  ;;  %302 = vmatpush.msrb.mxu0 %v281_v25 }
   0xe   :  { %v55_v47 = vadd.f32 %v365_v24, %v54_v42  ;;  %v49_v49 = vrot.slane %v48_v44, 1 }
   0xf   :  { %v29_v45 = vadd.f32 %v28_v40, %v27_v35  ;;  %v43_v46 = vadd.f32 %v42_v41, %v41_v36  ;;  %v36_v52 = vadd.f32 %v35_v48, %v34_v43  ;;  %303 = vmatpush.msrb.mxu0 %v280_v31 }
  0x10   :  { %v497_v50 = vsel %vm56_vm1, %v365_v24, %v55_v47  ;;  %v50_v56 = vadd.f32 %v49_v49, %v48_v44  ;;  %v311_v24 = vld [vmem:[%s556_s3 + $0x58] sm:$0xff]  ;;  %s401_s3 = smov [#allocation2]  }
  0x11   :  { %v58_v53 = vmul.f32 %v497_v50, %v29_v45  ;;  %v60_v54 = vmul.f32 %v497_v50, %v43_v46  ;;  %v169_v57 = vld [vmem:[#allocation1] sm:$0xff]  ;;  %v59_v58 = vmul.f32 %v497_v50, %v36_v52  ;;  %330 = vmatpush.msrb.mxu1 %v311_v24  ;;  %s345_s11 = sshll.u32 %s401_s3, 4  ;;  %s346_s11 = int_to_ptr.vmem [resolvable:$true] %s345_s11 }
  0x12   :  { %356 = vmatmul.msk.f32.vlgmr.msra.gmra.mxu0 %vm170_vm3, %v169_v57  ;;  %195 = vst [vmem:[#allocation1] ss:$9 sm:$0xff] %v154_v51  ;;  %v61_v62 = vmul.f32 %v497_v50, %v50_v56 }
  0x13   :  { %v62_v59 = vsub.f32 %v448_v7, %v58_v53  ;;  %v64_v60 = vsub.f32 %v453_v8, %v60_v54  ;;  %v227_v61 = vsel %vm226_vm2, %v60_v54, %v58_v53  ;;  %197 = vst [vmem:[#allocation1 + $0x1] ss:$9 sm:$0xff] %v155_v55  ;;  %v63_v63 = vsub.f32 %v458_v9, %v59_v58 }
  0x14   :  { %358 = vmatmul.msk.f32.vlgmr.msra.gmra.mxu2 %vm170_vm3, %v227_v61  ;;  %v65_v2 = vsub.f32 %v467_v12, %v61_v62  ;;  %331 = vmatpush.msrb.mxu1 %v310_v30  ;;  %v285_v37 = vsel %vm226_vm2, %v61_v62, %v59_v58 }
  0x15   :  { %v66_v0 = vmul.f32 %v62_v59, %v62_v59  ;;  %v68_v1 = vmul.f32 %v64_v60, %v64_v60  ;;  %v67_v3 = vmul.f32 %v63_v63, %v63_v63 }
  0x16   :  { %v69_v8 = vmul.f32 %v65_v2, %v65_v2  ;;  %332 = vmatpush.msrb.mxu1 %v309_v34 }
  0x17   :  { %v70_v4 = vsel %vm22_vm0, %v66_v0, 0.0  ;;  %v84_v5 = vsel %vm22_vm0, %v68_v1, 0.0  ;;  %v77_v10 = vsel %vm22_vm0, %v67_v3, 0.0 }
  0x18   :  { %v71_v6 = vrot.slane %v70_v4, 4  ;;  %v85_v7 = vrot.slane %v84_v5, 4  ;;  %v78_v11 = vrot.slane %v77_v10, 4  ;;  %v91_v15 = vsel %vm22_vm0, %v69_v8, 0.0 }
  0x19   :  { %v92_v17 = vrot.slane %v91_v15, 4 }
  0x1a   :  { %v72_v13 = vadd.f32 %v71_v6, %v70_v4  ;;  %v86_v14 = vadd.f32 %v85_v7, %v84_v5  ;;  %v198_v9 = vld [vmem:[#allocation1] sm:$0xff]  ;;  %v79_v16 = vadd.f32 %v78_v11, %v77_v10  ;;  %360 = vmatmul.msk.f32.vlgmr.msrb.gmra.mxu0 %vm170_vm3, %v285_v37 }
  0x1b   :  { %357 = vmatmul.msk.f32.vlgmr.msra.gmra.mxu1 %vm170_vm3, %v198_v9  ;;  %v93_v20 = vadd.f32 %v92_v17, %v91_v15 }
  0x1c   :  { %v73_v18 = vrot.slane %v72_v13, 2  ;;  %v87_v12 = vrot.slane %v86_v14, 2  ;;  %v80_v19 = vrot.slane %v79_v16, 2 }
  0x1d   :  { %v94_v27 = vrot.slane %v93_v20, 2 }
  0x1e   :  { %v74_v21 = vadd.f32 %v73_v18, %v72_v13  ;;  %v88_v22 = vadd.f32 %v87_v12, %v86_v14  ;;  %v81_v26 = vadd.f32 %v80_v19, %v79_v16 }
  0x1f   :  { %v95_v33 = vadd.f32 %v94_v27, %v93_v20 }
  0x20   :  { %v75_v28 = vrot.slane %v74_v21, 1  ;;  %v89_v29 = vrot.slane %v88_v22, 1  ;;  %v82_v32 = vrot.slane %v81_v26, 1 }
  0x21   :  { %v96_v39 = vrot.slane %v95_v33, 1 }
  0x22   :  { %v76_v35 = vadd.f32 %v75_v28, %v74_v21  ;;  %v90_v36 = vadd.f32 %v89_v29, %v88_v22  ;;  %v83_v38 = vadd.f32 %v82_v32, %v81_v26 }
  0x23   :  { %v97_v42 = vadd.f32 %v96_v39, %v95_v33 }
  0x24   :  { %v98_v40 = vmul.f32 %v76_v35, %v497_v50  ;;  %v100_v41 = vmul.f32 %v90_v36, %v497_v50  ;;  %v99_v43 = vmul.f32 %v83_v38, %v497_v50 }
  0x25   :  { %v101_v46 = vmul.f32 %v97_v42, %v497_v50 }
  0x26   :  { %v102_v44 = vadd.f32 1e-05, %v98_v40  ;;  %v104_v45 = vadd.f32 1e-05, %v100_v41  ;;  %v103_v47 = vadd.f32 1e-05, %v99_v43 }
  0x27   :  { %v105_v48 = vadd.f32 1e-05, %v101_v46 }
  0x28   :  { %366 = vrsqrt.f32 %v102_v44  ;;  %vm113_vm4 = vcmp.eq.f32.partialorder %v102_v44, inf  ;;  %vm115_vm5 = vcmp.eq.f32.partialorder %v102_v44, 0.0  ;;  %v116_v5 = vand.u32 2147483648, %v102_v44 }
  0x29   :  { %368 = vrsqrt.f32 %v104_v45  ;;  %vm137_vm6 = vcmp.eq.f32.partialorder %v104_v45, inf  ;;  %v140_v8 = vand.u32 2147483648, %v104_v45  ;;  %vm139_vm7 = vcmp.eq.f32.partialorder %v104_v45, 0.0 }
  0x2a   :  { %370 = vrsqrt.f32 %v103_v47  ;;  %vm125_vm8 = vcmp.eq.f32.partialorder %v103_v47, inf  ;;  %v128_v14 = vand.u32 2147483648, %v103_v47  ;;  %vm127_vm9 = vcmp.eq.f32.partialorder %v103_v47, 0.0 }
  0x2b   :  { %372 = vrsqrt.f32 %v105_v48  ;;  %vm149_vm10 = vcmp.eq.f32.partialorder %v105_v48, inf  ;;  %v152_v12 = vand.u32 2147483648, %v105_v48  ;;  %vm151_vm11 = vcmp.eq.f32.partialorder %v105_v48, 0.0 }
  0x2e   :  { %v367_v49 = vpop.eup %366 }
  0x2f   :  { %v369_v51 = vpop.eup %368  ;;  %v107_v52 = vmul.f32 %v367_v49, %v102_v44 }
  0x30   :  { %v371_v53 = vpop.eup %370  ;;  %v131_v54 = vmul.f32 %v369_v51, %v104_v45 }
  0x31   :  { %v108_v55 = vmul.f32 %v367_v49, %v107_v52  ;;  %v119_v56 = vmul.f32 %v371_v53, %v103_v47  ;;  %v373_v57 = vpop.eup %372 }
  0x32   :  { %v132_v58 = vmul.f32 %v369_v51, %v131_v54  ;;  %v143_v61 = vmul.f32 %v373_v57, %v105_v48 }
  0x33   :  { %v109_v59 = vmul.f32 0.5, %v108_v55  ;;  %v120_v60 = vmul.f32 %v371_v53, %v119_v56 }
  0x34   :  { %v133_v62 = vmul.f32 0.5, %v132_v58  ;;  %v144_v0 = vmul.f32 %v373_v57, %v143_v61 }
  0x35   :  { %v110_v50 = vsub.f32 1.5, %v109_v59  ;;  %v121_v63 = vmul.f32 0.5, %v120_v60 }
  0x36   :  { %v134_v1 = vsub.f32 1.5, %v133_v62  ;;  %v145_v4 = vmul.f32 0.5, %v144_v0 }
  0x37   :  { %v111_v2 = vmul.f32 %v367_v49, %v110_v50  ;;  %v122_v3 = vsub.f32 1.5, %v121_v63 }
  0x38   :  { %v135_v6 = vmul.f32 %v369_v51, %v134_v1  ;;  %v146_v11 = vsub.f32 1.5, %v145_v4 }
  0x39   :  { %v112_v7 = vmul.f32 %v111_v2, %v102_v44  ;;  %v123_v10 = vmul.f32 %v371_v53, %v122_v3 }
  0x3a   :  { %v136_v13 = vmul.f32 %v135_v6, %v104_v45  ;;  %v147_v16 = vmul.f32 %v373_v57, %v146_v11 }
  0x3b   :  { %v114_v15 = vsel %vm113_vm4, %v102_v44, %v112_v7  ;;  %v124_v9 = vmul.f32 %v123_v10, %v103_v47 }
  0x3c   :  { %v117_v17 = vsel %vm115_vm5, %v116_v5, %v114_v15  ;;  %v138_v18 = vsel %vm137_vm6, %v104_v45, %v136_v13  ;;  %v148_v21 = vmul.f32 %v147_v16, %v105_v48 }
  0x3d   :  { %v141_v19 = vsel %vm139_vm7, %v140_v8, %v138_v18  ;;  %v126_v20 = vsel %vm125_vm8, %v103_v47, %v124_v9 }
  0x3e   :  { %v256_v22 = vsel %vm226_vm2, %v141_v19, %v117_v17  ;;  %v129_v23 = vsel %vm127_vm9, %v128_v14, %v126_v20  ;;  %v150_v24 = vsel %vm149_vm10, %v105_v48, %v148_v21 }
  0x3f   :  { %359 = vmatmul.msk.f32.vlgmr.msra.gmra.mxu3 %vm170_vm3, %v256_v22  ;;  %v153_v25 = vsel %vm151_vm11, %v152_v12, %v150_v24 }
  0x40   :  { %v314_v26 = vsel %vm226_vm2, %v153_v25, %v129_v23 }
  0x41   :  { %361 = vmatmul.msk.f32.vlgmr.msrb.gmra.mxu1 %vm170_vm3, %v314_v26 }
  0x8f   :  { %v190_v27 = vpop.f32.mrf.mxu0 }
  0x97   :  { %v247_v30 = vpop.f32.mrf.mxu2  ;;  %v305_v33 = vpop.f32.mrf.mxu0 }
  0x98   :  { %v218_v28 = vpop.f32.mrf.mxu1 }
  0x99   :  { %v219_v29 = vadd.f32 %v218_v28, %v190_v27 }
  0x9b   :  { %v250_v31 = vadd.f32 %v247_v30, %v219_v29 }
  0xbe   :  { %v334_v35 = vpop.f32.mrf.mxu1 }
  0xc2   :  { %v276_v32 = vpop.f32.mrf.mxu3 }
  0xc3   :  { %v279_v34 = vadd.f32 %v276_v32, %v250_v31 }
  0xc5   :  { %v308_v36 = vadd.f32 %v305_v33, %v279_v34 }
  0xc7   :  { %v337_v37 = vadd.f32 %v334_v35, %v308_v36 }
  0xc9   :  { %339 = vst.msk [vmem:[#allocation2] sm:$0x3] %vm338_vm12, %v337_v37 }
  0xca   :  { %350 = dma.vmem_to_hbm [thread:$0]  %s346_s11, 32, %s348_s14, [#allocation3]  }
  0xcb   :  { %398 = dma.done.wait [#allocation3], 32  }
  0xcc   :  { %399 = vsyncadd [#allocation3], 4294967264 }
  0xcd   :  { %355 = vsyncpa [#allocation3], 1 }

</bundles_post_ra>
